<compile_context>
chip_gen: v7x
topology: tpu7x:2x2x1
jax: 0.10.0
libtpu: 0.0.40
codegen_flags: <defaults>
</compile_context>

<pallas_src>
import jax
import jax.numpy as jnp
from jax.experimental import pallas as pl
from jax.experimental.pallas import tpu as pltpu


def _round_up(n: int, m: int) -> int:
    return ((n + m - 1) // m) * m


def make_fnn_kernel(n_layers: int, apply_sigmoid: bool, negative_slope: float):
    """Full MLP for one batch tile, entirely in VMEM. Last layer computed transposed."""

    def kernel(x_ref, *refs):
        o_ref = refs[-1]
        p = refs[:-1]  # (w0, b0, w1, b1, ..., w_lastT, b_lastT)

        h = x_ref[...]  # bf16 [TILE_B, n_features]

        # Hidden layers: (B, in) @ (in, out) on the MXU (bf16 in, f32 accumulate);
        # bias-add / LeakyReLU in f32 on the VPU (safe on v5e too).
        for layer in range(n_layers - 1):
            w = p[2 * layer][...]       # bf16 [in, out]
            b = p[2 * layer + 1][...]   # f32  [1, out]
            h = jnp.dot(h.astype(w.dtype), w, preferred_element_type=jnp.float32) + b
            h = jnp.maximum(h, negative_slope * h)  # LeakyReLU as mul + max

        # Last layer, transposed: contract (out, hid) with (TILE_B, hid) over hid ->
        # (out_dim, TILE_B), so the tiny out_dim lands on sublanes and the batch tile
        # on lanes (lane-dense, unmasked stores).
        w_t = p[-2][...]                # bf16 [out_dim, hid_last]
        b_t = p[-1][...]                # f32  [out_dim, 1]
        z = jax.lax.dot_general(
            w_t, h.astype(w_t.dtype),
            dimension_numbers=(((1,), (1,)), ((), ())),
            preferred_element_type=jnp.float32,
        ) + b_t
        if apply_sigmoid:
            # sigmoid(z) = 1 / (1 + exp(-z)); exp + reciprocal both run on the EUP.
            z = pl.reciprocal(1.0 + jnp.exp(-z), approx=True)
        else:
            z = jnp.maximum(z, negative_slope * z)
        o_ref[...] = z.astype(o_ref.dtype)

    return kernel


def prepare_params(params, weight_dtype=jnp.bfloat16):
    """One-time param prep (cast / reshape / transpose). Reuse across fnn_forward calls."""
    n_layers = len(params)
    flat = []
    for li, (w, b) in enumerate(params):
        if li < n_layers - 1:
            flat.append(jnp.asarray(w, weight_dtype))                  # [in, out]
            flat.append(jnp.asarray(b, jnp.float32).reshape(1, -1))    # [1, out]
        else:
            flat.append(jnp.asarray(w, weight_dtype).T)                # [out, in] pre-transposed
            flat.append(jnp.asarray(b, jnp.float32).reshape(-1, 1))    # [out, 1]
    meta = dict(
        n_layers=n_layers,
        in_dim=int(params[0][0].shape[0]),
        out_dim=int(params[-1][0].shape[1]),
        layer_dims=[(int(w.shape[0]), int(w.shape[1])) for w, _ in params],
    )
    return flat, meta


def _choose_tile_b(b_pad: int, tile_b_max: int, target_steps: int = 8) -> int:
    """TILE_B: multiple of 128, <= tile_b_max, aiming for ~target_steps grid steps."""
    tile = min(tile_b_max, b_pad)
    if b_pad >= 2 * 128:
        # Give large batches >= ~8 grid steps (pipelining; both v7x TensorCores),
        # never dropping below 128 rows per tile.
        tile = min(tile, max(128, _round_up(-(-b_pad // target_steps), 128)))
    return tile


def fnn_forward(x, flat_params, meta, apply_sigmoid: bool = True,
                negative_slope: float = 0.01, tile_b_max: int = 2048):
    """x: [batch, n_features] f32; flat_params/meta from prepare_params()."""
    n_layers = meta["n_layers"]
    out_dim = meta["out_dim"]
    batch, n_features = x.shape
    assert n_features == meta["in_dim"], "feature dim mismatch"

    # Batch padding: multiple of 128 rows (lane-dense transposed output + 16-row bf16
    # sublane packing on v5e).  Features are NOT padded.
    b_pad = _round_up(max(batch, 128), 128)
    tile_b = _choose_tile_b(b_pad, tile_b_max)
    b_pad = _round_up(b_pad, tile_b)
    nb = b_pad // tile_b

    # bf16 input halves the dominant per-tile DMA stream; single pad on batch axis only.
    x_p = jnp.pad(x.astype(jnp.bfloat16), ((0, b_pad - batch), (0, 0)))

    kernel = make_fnn_kernel(n_layers, apply_sigmoid, negative_slope)

    x_spec = pl.BlockSpec((tile_b, n_features), lambda i: (i, 0))
    # Full-array blocks with constant index_map -> params stay resident in VMEM.
    param_specs = [pl.BlockSpec(p.shape, lambda i: (0, 0)) for p in flat_params]
    out_spec = pl.BlockSpec((out_dim, tile_b), lambda i: (0, i))

    flops = 2 * b_pad * sum(i * o for (i, o) in meta["layer_dims"])
    transcendentals = b_pad * out_dim if apply_sigmoid else 0
    bytes_accessed = int(
        x_p.size * x_p.dtype.itemsize
        + sum(int(p.size) * p.dtype.itemsize for p in flat_params)
        + b_pad * out_dim * 4
    )

    out = pl.pallas_call(
        kernel,
        out_shape=jax.ShapeDtypeStruct((out_dim, b_pad), jnp.float32),
        grid_spec=pltpu.PrefetchScalarGridSpec(
            num_scalar_prefetch=0,
            grid=(nb,),
            in_specs=[x_spec] + param_specs,
            out_specs=out_spec,
        ),
        compiler_params=pltpu.CompilerParams(
            dimension_semantics=("parallel",),
            # Per-tile footprint (bf16 x tile + f32 intermediates + tiny params) is a
            # few MiB even at TILE_B=2048 -> comfortably inside every generation.
            vmem_limit_bytes=32 * 1024 * 1024,
        ),
        cost_estimate=pl.CostEstimate(
            flops=int(flops),
            transcendentals=int(transcendentals),
            bytes_accessed=bytes_accessed,
        ),
    )(x_p, *flat_params)

    # Drop batch padding, restore (batch, out_dim) orientation, torch-style .squeeze().
    return jnp.squeeze(out[:, :batch].T)


def init_params(key, layer_sizes):
    """Deterministic init mimicking nn.Linear's uniform(-1/sqrt(fan_in), 1/sqrt(fan_in))."""
    params = []
    for i in range(len(layer_sizes) - 1):
        fan_in, fan_out = layer_sizes[i], layer_sizes[i + 1]
        key, wk, bk = jax.random.split(key, 3)
        bound = 1.0 / jnp.sqrt(fan_in)
        w = jax.random.uniform(wk, (fan_in, fan_out), jnp.float32, -bound, bound)
        b = jax.random.uniform(bk, (1, fan_out), jnp.float32, -bound, bound)
        params.append((w, b))
    return params


if __name__ == "__main__":
    # FNN(n_features=32, output_dim=1, hidden_layer_sizes=[64, 32],
    #     dropout_rate=None, apply_sigmoid=True)
    n_features = 32
    hidden_layer_sizes = [64, 32]
    output_dim = 1
    apply_sigmoid = True
    batch = 8

    layer_sizes = [n_features] + hidden_layer_sizes + [output_dim]

    key = jax.random.PRNGKey(0)
    key, xk = jax.random.split(key)
    x = jax.random.normal(xk, (batch, n_features), jnp.float32)
    params = init_params(key, layer_sizes)

    flat_params, meta = prepare_params(params)   # one-time prep: kept out of the hot path
    y = fnn_forward(x, flat_params, meta, apply_sigmoid=apply_sigmoid)
    y = jax.block_until_ready(y)

    # Pure-f32 JAX reference (PyTorch semantics).  The kernel uses bf16 inputs/weights
    # on the MXU and an approximate EUP reciprocal in the sigmoid, so compare with a
    # modest tolerance on the (0,1)-ranged sigmoid outputs.
    h = x
    for i, (w, b) in enumerate(params):
        h = h @ w + b.reshape(1, -1)
        if i == len(params) - 1 and apply_sigmoid:
            h = jax.nn.sigmoid(h)
        else:
            h = jnp.where(h >= 0, h, 0.01 * h)
    ref = jnp.squeeze(h)

    assert y.shape == ref.shape == (batch,), f"unexpected output shape {y.shape}"
    assert jnp.allclose(y, ref, atol=1e-2, rtol=1e-2), "kernel/reference mismatch"

    print("KERNEL_OK")
</pallas_src>

<mosaic_0001>
module attributes {stable_mosaic.version = 11 : i64} {
  func.func @kernel(%arg0: i32, %arg1: memref<128x32xbf16, #tpu.memory_space<vmem>>, %arg2: memref<32x64xbf16, #tpu.memory_space<vmem>>, %arg3: memref<1x64xf32, #tpu.memory_space<vmem>>, %arg4: memref<64x32xbf16, #tpu.memory_space<vmem>>, %arg5: memref<1x32xf32, #tpu.memory_space<vmem>>, %arg6: memref<1x32xbf16, #tpu.memory_space<vmem>>, %arg7: memref<1x1xf32, #tpu.memory_space<vmem>>, %arg8: memref<1x128xf32, #tpu.memory_space<vmem>>) attributes {dimension_semantics = [#tpu.dimension_semantics<parallel>], iteration_bounds = array<i64: 1>, scalar_prefetch = 0 : i64, scratch_operands = 0 : i64, tpu.core_type = #tpu.core_type<tc>, window_params = [{transform_indices = @transform_0, window_bounds = array<i64: 128, 32>}, {pipeline_mode = #tpu.pipeline_mode<synchronous>, transform_indices = @transform_1, window_bounds = array<i64: 32, 64>}, {pipeline_mode = #tpu.pipeline_mode<synchronous>, transform_indices = @transform_2, window_bounds = array<i64: 1, 64>}, {pipeline_mode = #tpu.pipeline_mode<synchronous>, transform_indices = @transform_3, window_bounds = array<i64: 64, 32>}, {pipeline_mode = #tpu.pipeline_mode<synchronous>, transform_indices = @transform_4, window_bounds = array<i64: 1, 32>}, {pipeline_mode = #tpu.pipeline_mode<synchronous>, transform_indices = @transform_5, window_bounds = array<i64: 1, 32>}, {pipeline_mode = #tpu.pipeline_mode<synchronous>, transform_indices = @transform_6, window_bounds = array<i64: 1, 1>}, {transform_indices = @transform_7, window_bounds = array<i64: 1, 128>}]} {
    %c0 = arith.constant 0 : index
    %c0_0 = arith.constant 0 : index
    %0 = vector.load %arg1[%c0, %c0_0] : memref<128x32xbf16, #tpu.memory_space<vmem>>, vector<128x32xbf16>
    %c0_1 = arith.constant 0 : index
    %c0_2 = arith.constant 0 : index
    %1 = vector.load %arg2[%c0_1, %c0_2] : memref<32x64xbf16, #tpu.memory_space<vmem>>, vector<32x64xbf16>
    %c0_3 = arith.constant 0 : index
    %c0_4 = arith.constant 0 : index
    %2 = vector.load %arg3[%c0_3, %c0_4] : memref<1x64xf32, #tpu.memory_space<vmem>>, vector<1x64xf32>
    %cst = arith.constant dense<0.000000e+00> : vector<128x64xf32>
    %3 = tpu.matmul %0, %1, %cst {dimension_numbers = #tpu.dot_dimension_numbers<[1], [0], [0], [1], [0, 0, 1, 1], [], []>} : vector<128x32xbf16>, vector<32x64xbf16>, vector<128x64xf32> -> vector<128x64xf32>
    %4 = vector.broadcast %2 : vector<1x64xf32> to vector<128x64xf32>
    %5 = arith.addf %3, %4 : vector<128x64xf32>
    %cst_5 = arith.constant 0.00999999977 : f32
    %6 = vector.broadcast %cst_5 : f32 to vector<128x64xf32>
    %7 = arith.mulf %6, %5 : vector<128x64xf32>
    %8 = arith.maximumf %5, %7 : vector<128x64xf32>
    %c0_6 = arith.constant 0 : index
    %c0_7 = arith.constant 0 : index
    %9 = vector.load %arg4[%c0_6, %c0_7] : memref<64x32xbf16, #tpu.memory_space<vmem>>, vector<64x32xbf16>
    %c0_8 = arith.constant 0 : index
    %c0_9 = arith.constant 0 : index
    %10 = vector.load %arg5[%c0_8, %c0_9] : memref<1x32xf32, #tpu.memory_space<vmem>>, vector<1x32xf32>
    %11 = arith.truncf %8 : vector<128x64xf32> to vector<128x64xbf16>
    %cst_10 = arith.constant dense<0.000000e+00> : vector<128x32xf32>
    %12 = tpu.matmul %11, %9, %cst_10 {dimension_numbers = #tpu.dot_dimension_numbers<[1], [0], [0], [1], [0, 0, 1, 1], [], []>} : vector<128x64xbf16>, vector<64x32xbf16>, vector<128x32xf32> -> vector<128x32xf32>
    %13 = vector.broadcast %10 : vector<1x32xf32> to vector<128x32xf32>
    %14 = arith.addf %12, %13 : vector<128x32xf32>
    %cst_11 = arith.constant 0.00999999977 : f32
    %15 = vector.broadcast %cst_11 : f32 to vector<128x32xf32>
    %16 = arith.mulf %15, %14 : vector<128x32xf32>
    %17 = arith.maximumf %14, %16 : vector<128x32xf32>
    %c0_12 = arith.constant 0 : index
    %c0_13 = arith.constant 0 : index
    %18 = vector.load %arg6[%c0_12, %c0_13] : memref<1x32xbf16, #tpu.memory_space<vmem>>, vector<1x32xbf16>
    %c0_14 = arith.constant 0 : index
    %c0_15 = arith.constant 0 : index
    %19 = vector.load %arg7[%c0_14, %c0_15] : memref<1x1xf32, #tpu.memory_space<vmem>>, vector<1x1xf32>
    %20 = arith.truncf %17 : vector<128x32xf32> to vector<128x32xbf16>
    %cst_16 = arith.constant dense<0.000000e+00> : vector<1x128xf32>
    %21 = tpu.matmul %18, %20, %cst_16 {dimension_numbers = #tpu.dot_dimension_numbers<[1], [1], [0], [0], [0, 0, 1, 0], [], []>} : vector<1x32xbf16>, vector<128x32xbf16>, vector<1x128xf32> -> vector<1x128xf32>
    %22 = vector.broadcast %19 : vector<1x1xf32> to vector<1x128xf32>
    %23 = arith.addf %21, %22 : vector<1x128xf32>
    %cst_17 = arith.constant 0.000000e+00 : f32
    %24 = vector.broadcast %cst_17 : f32 to vector<1x128xf32>
    %25 = arith.subf %24, %23 : vector<1x128xf32>
    %26 = math.exp %25 : vector<1x128xf32>
    %cst_18 = arith.constant 1.000000e+00 : f32
    %27 = vector.broadcast %cst_18 : f32 to vector<1x128xf32>
    %28 = arith.addf %27, %26 : vector<1x128xf32>
    %29 = tpu.reciprocal %28 {approx = true} : vector<1x128xf32> -> vector<1x128xf32>
    %c0_19 = arith.constant 0 : index
    %c0_20 = arith.constant 0 : index
    %30 = vector.load %arg8[%c0_19, %c0_20] : memref<1x128xf32, #tpu.memory_space<vmem>>, vector<1x128xf32>
    tpu.vector_store %arg8[%c0_19, %c0_20], %29 {strides = array<i32>} : memref<1x128xf32, #tpu.memory_space<vmem>>, vector<1x128xf32>,
    return
  }
  func.func @transform_0(%arg0: i32) -> (i32, i32) {
    %c0_i32 = arith.constant 0 : i32
    %c0_i32_0 = arith.constant 0 : i32
    return %arg0, %c0_i32 : i32, i32
  }
  func.func @transform_1(%arg0: i32) -> (i32, i32) {
    %c0_i32 = arith.constant 0 : i32
    %c0_i32_0 = arith.constant 0 : i32
    %c0_i32_1 = arith.constant 0 : i32
    return %c0_i32, %c0_i32_0 : i32, i32
  }
  func.func @transform_2(%arg0: i32) -> (i32, i32) {
    %c0_i32 = arith.constant 0 : i32
    %c0_i32_0 = arith.constant 0 : i32
    %c0_i32_1 = arith.constant 0 : i32
    return %c0_i32, %c0_i32_0 : i32, i32
  }
  func.func @transform_3(%arg0: i32) -> (i32, i32) {
    %c0_i32 = arith.constant 0 : i32
    %c0_i32_0 = arith.constant 0 : i32
    %c0_i32_1 = arith.constant 0 : i32
    return %c0_i32, %c0_i32_0 : i32, i32
  }
  func.func @transform_4(%arg0: i32) -> (i32, i32) {
    %c0_i32 = arith.constant 0 : i32
    %c0_i32_0 = arith.constant 0 : i32
    %c0_i32_1 = arith.constant 0 : i32
    return %c0_i32, %c0_i32_0 : i32, i32
  }
  func.func @transform_5(%arg0: i32) -> (i32, i32) {
    %c0_i32 = arith.constant 0 : i32
    %c0_i32_0 = arith.constant 0 : i32
    %c0_i32_1 = arith.constant 0 : i32
    return %c0_i32, %c0_i32_0 : i32, i32
  }
  func.func @transform_6(%arg0: i32) -> (i32, i32) {
    %c0_i32 = arith.constant 0 : i32
    %c0_i32_0 = arith.constant 0 : i32
    %c0_i32_1 = arith.constant 0 : i32
    return %c0_i32, %c0_i32_0 : i32, i32
  }
  func.func @transform_7(%arg0: i32) -> (i32, i32) {
    %c0_i32 = arith.constant 0 : i32
    %c0_i32_0 = arith.constant 0 : i32
    return %c0_i32, %arg0 : i32, i32
  }
}

</mosaic_0001>

<bundles_post_ra>
// kernel: tpu_custom_call.1
= control target key start
LH: loop header
LB: loop body
LE: loop exit
PB: predicated region body
PF: predicated region fallthrough
CT: control target
= control target key end

     0   :  { %s925_s0 = inlined_call_operand.vmem [shape: bf16[128,32], index: 0, kind: input, shape index: {}]   ;;  %s926_s1 = inlined_call_operand.vmem [shape: bf16[32,64], index: 1, kind: input, shape index: {}]   ;;  %s927_s2 = inlined_call_operand.vmem [shape: f32[1,64], index: 2, kind: input, shape index: {}]   ;;  %s928_s3 = inlined_call_operand.vmem [shape: bf16[64,32], index: 3, kind: input, shape index: {}]   ;;  %s929_s4 = inlined_call_operand.vmem [shape: f32[1,32], index: 4, kind: input, shape index: {}]   ;;  %s930_s5 = inlined_call_operand.vmem [shape: bf16[1,32], index: 5, kind: input, shape index: {}]   ;;  %s931_s6 = inlined_call_operand.<no memory space> [shape: f32[1,1], index: 6, kind: input, shape index: {}]   ;;  %s932_s7 = inlined_call_operand.hbm [shape: f32[1,128], index: 7, kind: output, shape index: {}]  }
   0x1   :  { %v12_v0 = vstv %s931_s6 }
   0x2   :  { %13 = vst [vmem:[#allocation2] sm:$0x1] %v12_v0 }
   0x3   :  { %v703_v1 = vld [vmem:[%s926_s1] sm:$0xff]   ;;  %v704_v2 = vld [vmem:[%s926_s1 + $0x8] sm:$0xff]   ;;  %vm109_vm0 = vcmask 261120   ;;  %v707_v5 = vld [vmem:[%s925_s0 + $0x10] sm:$0xff]  }
   0x4   :  { %634 = vmatprep.subr.bf16.mxu1 %v703_v1  ;;  %v705_v3 = vld [vmem:[%s925_s0] sm:$0xff]   ;;  %v706_v4 = vld [vmem:[%s925_s0 + $0x8] sm:$0xff]  }
   0x5   :  { %635 = vmatpush3.bf16.msra.mxu1 %v703_v1  ;;  %638 = vmatprep.mubr.msk.bf16.mxu1 %vm109_vm0, %v705_v3  ;;  %v713_v6 = vld [vmem:[%s928_s3] sm:$0xff]   ;;  %v714_v7 = vld [vmem:[%s928_s3 + $0x8] sm:$0xff]  }
   0x6   :  { %636 = vmatprep.subr.bf16.mxu1 %v704_v2 }
   0x9   :  { %637 = vmatpush3.bf16.msra.mxu1 %v704_v2 }
   0xa   :  { %654 = vmatprep.subr.bf16.mxu1 %v713_v6 }
   0xc   :  { %639 = vmatmul.mubr.msk.bf16.vlgmr.msra.gmra.mrb[0].mxu1 %vm109_vm0, %v706_v4 }
   0xd   :  { %642 = vmatprep.mubr.msk.bf16.mxu1 %vm109_vm0, %v707_v5  ;;  %655 = vmatpush3.bf16.msra.mxu1 %v713_v6 }
   0xe   :  { %14 = vsyncpa [#allocation4], 0  ;;  %v708_v8 = vld [vmem:[%s925_s0 + $0x18] sm:$0xff]   ;;  %656 = vmatprep.subr.bf16.mxu1 %v714_v7  ;;  %v715_v9 = vld [vmem:[%s928_s3 + $0x10] sm:$0xff]   ;;  %vm310_vm1 = vcmask 523264   ;;  %vm746_vm2 = vmmov 0  }
   0xf   :  { %v709_v10 = vld [vmem:[%s925_s0 + $0x20] sm:$0xff]   ;;  %v710_v11 = vld [vmem:[%s925_s0 + $0x28] sm:$0xff]   ;;  %v711_v12 = vld [vmem:[%s925_s0 + $0x30] sm:$0xff]   ;;  %s748_s8 = smov [#allocation3]  }
  0x10   :  { %v712_v13 = vld [vmem:[%s925_s0 + $0x38] sm:$0xff]   ;;  %v845_v15 = vld [vmem:[%s927_s2] ss:$0 sm:$0xff] }
  0x11   :  { %657 = vmatpush3.bf16.msra.mxu1 %v714_v7  ;;  %v716_v14 = vld [vmem:[%s928_s3 + $0x18] sm:$0xff]  }
  0x12   :  { %658 = vmatprep.subr.bf16.mxu1 %v715_v9 }
  0x14   :  { %643 = vmatmul.mubr.msk.bf16.gmra.mrb[4].mxu1 %vm109_vm0, %v708_v8 }
  0x15   :  { %646 = vmatprep.mubr.msk.bf16.mxu1 %vm109_vm0, %v709_v10  ;;  %659 = vmatpush3.bf16.msra.mxu1 %v715_v9 }
  0x16   :  { %660 = vmatprep.subr.bf16.mxu1 %v716_v14 }
  0x19   :  { %661 = vmatpush3.bf16.msra.mxu1 %v716_v14 }
  0x1c   :  { %647 = vmatmul.mubr.msk.bf16.gmra.mrb[8].mxu1 %vm109_vm0, %v710_v11 }
  0x1d   :  { %650 = vmatprep.mubr.msk.bf16.mxu1 %vm109_vm0, %v711_v12 }
  0x24   :  { %651 = vmatmul.mubr.msk.bf16.gmra.mrb[12].mxu1 %vm109_vm0, %v712_v13 }
  0xdf   :  { %v640_v16 = vpop.f32.mrb[0].mxu1 }
  0xe0   :  { %v177_v17 = vadd.f32 %v640_v16, %v845_v15  ;;  %v168_v18 = vpop.f32.mrb[1].mxu1 }
  0xe1   :  { %v169_v19 = vadd.f32 %v845_v15, %v168_v18  ;;  %v641_v20 = vpop.f32.mrb[2].mxu1 }
  0xe2   :  { %v233_v21 = vmul.f32 0.01, %v177_v17  ;;  %v180_v22 = vadd.f32 %v641_v20, %v845_v15  ;;  %v171_v23 = vpop.f32.mrb[3].mxu1 }
  0xe3   :  { %v231_v24 = vmul.f32 0.01, %v169_v19  ;;  %v172_v25 = vadd.f32 %v845_v15, %v171_v23 }
  0xe4   :  { %v234_v26 = vmul.f32 0.01, %v180_v22  ;;  %v249_v28 = vmax.f32 %v177_v17, %v233_v21 }
  0xe5   :  { %v232_v27 = vmul.f32 0.01, %v172_v25  ;;  %v247_v30 = vmax.f32 %v169_v19, %v231_v24 }
  0xe6   :  { %v250_v29 = vmax.f32 %v180_v22, %v234_v26  ;;  %v747_v26 = vmov 0  }
  0xe7   :  { %v248_v31 = vmax.f32 %v172_v25, %v232_v27  ;;  %v644_v32 = vpop.f32.mrb[4].mxu1  ;;  %v745_v25 = vmov 0.0   ;;  %702 = vset.pattern.permute.xlu0 %v747_v26  ;;  %v876_v27 = vld [vmem:[%s929_s4] ss:$0 sm:$0xff] }
  0xe8   :  { %v273_v33 = vpack.c.bf16 %v250_v29, %v249_v28  ;;  %v193_v34 = vadd.f32 %v644_v32, %v845_v15  ;;  %v184_v35 = vpop.f32.mrb[5].mxu1  ;;  %678 = vmatprep.subr.bf16.mxu0 %v745_v25  ;;  %694 = vmatprep.mubr.msk.bf16.mxu0 %vm746_vm2, %v745_v25 }
  0xe9   :  { %v272_v36 = vpack.c.bf16 %v248_v31, %v247_v30  ;;  %v185_v37 = vadd.f32 %v845_v15, %v184_v35  ;;  %v645_v38 = vpop.f32.mrb[6].mxu1 }
  0xea   :  { %v237_v39 = vmul.f32 0.01, %v193_v34  ;;  %v196_v40 = vadd.f32 %v645_v38, %v845_v15  ;;  %v187_v41 = vpop.f32.mrb[7].mxu1 }
  0xeb   :  { %v235_v42 = vmul.f32 0.01, %v185_v37  ;;  %v188_v43 = vadd.f32 %v845_v15, %v187_v41  ;;  %662 = vmatprep.mubr.msk.bf16.mxu1 %vm310_vm1, %v272_v36 }
  0xec   :  { %v253_v44 = vmax.f32 %v193_v34, %v237_v39  ;;  %v238_v45 = vmul.f32 0.01, %v196_v40  ;;  %663 = vmatmul.mubr.msk.bf16.vlgmr.msra.gmra.mrb[16].mxu1 %vm310_vm1, %v273_v33 }
  0xed   :  { %v251_v46 = vmax.f32 %v185_v37, %v235_v42  ;;  %v236_v47 = vmul.f32 0.01, %v188_v43 }
  0xee   :  { %v254_v48 = vmax.f32 %v196_v40, %v238_v45 }
  0xef   :  { %v252_v49 = vmax.f32 %v188_v43, %v236_v47  ;;  %v648_v50 = vpop.f32.mrb[8].mxu1 }
  0xf0   :  { %v275_v51 = vpack.c.bf16 %v254_v48, %v253_v44  ;;  %v209_v52 = vadd.f32 %v648_v50, %v845_v15  ;;  %v200_v53 = vpop.f32.mrb[9].mxu1 }
  0xf1   :  { %v274_v54 = vpack.c.bf16 %v252_v49, %v251_v46  ;;  %v201_v55 = vadd.f32 %v845_v15, %v200_v53  ;;  %v649_v56 = vpop.f32.mrb[10].mxu1 }
  0xf2   :  { %v241_v57 = vmul.f32 0.01, %v209_v52  ;;  %v212_v58 = vadd.f32 %v649_v56, %v845_v15  ;;  %v203_v59 = vpop.f32.mrb[11].mxu1 }
  0xf3   :  { %666 = vmatprep.mubr.msk.bf16.mxu1 %vm310_vm1, %v274_v54  ;;  %v239_v60 = vmul.f32 0.01, %v201_v55  ;;  %v204_v61 = vadd.f32 %v845_v15, %v203_v59 }
  0xf4   :  { %v257_v62 = vmax.f32 %v209_v52, %v241_v57  ;;  %667 = vmatmul.mubr.msk.bf16.gmra.mrb[20].mxu1 %vm310_vm1, %v275_v51  ;;  %v242_v63 = vmul.f32 0.01, %v212_v58 }
  0xf5   :  { %v255_v0 = vmax.f32 %v201_v55, %v239_v60  ;;  %v240_v1 = vmul.f32 0.01, %v204_v61 }
  0xf6   :  { %v258_v2 = vmax.f32 %v212_v58, %v242_v63 }
  0xf7   :  { %v256_v3 = vmax.f32 %v204_v61, %v240_v1  ;;  %v652_v4 = vpop.f32.mrb[12].mxu1 }
  0xf8   :  { %v277_v5 = vpack.c.bf16 %v258_v2, %v257_v62  ;;  %v225_v6 = vadd.f32 %v652_v4, %v845_v15  ;;  %v216_v7 = vpop.f32.mrb[13].mxu1 }
  0xf9   :  { %v276_v8 = vpack.c.bf16 %v256_v3, %v255_v0  ;;  %v217_v9 = vadd.f32 %v845_v15, %v216_v7  ;;  %v653_v10 = vpop.f32.mrb[14].mxu1 }
  0xfa   :  { %v245_v11 = vmul.f32 0.01, %v225_v6  ;;  %v228_v12 = vadd.f32 %v653_v10, %v845_v15  ;;  %v219_v13 = vpop.f32.mrb[15].mxu1 }
  0xfb   :  { %670 = vmatprep.mubr.msk.bf16.mxu1 %vm310_vm1, %v276_v8  ;;  %v243_v14 = vmul.f32 0.01, %v217_v9  ;;  %v220_v16 = vadd.f32 %v845_v15, %v219_v13  ;;  %v465_v15 = vld [vmem:[#allocation2] sm:$0x1] }
  0xfc   :  { %671 = vmatmul.mubr.msk.bf16.gmra.mrb[24].mxu1 %vm310_vm1, %v277_v5  ;;  %v261_v17 = vmax.f32 %v225_v6, %v245_v11  ;;  %v246_v18 = vmul.f32 0.01, %v228_v12  ;;  %476 = vperm.xlu0 %702, %v465_v15  }
  0xfd   :  { %v259_v19 = vmax.f32 %v217_v9, %v243_v14  ;;  %v244_v20 = vmul.f32 0.01, %v220_v16 }
  0xfe   :  { %v262_v21 = vmax.f32 %v228_v12, %v246_v18 }
  0xff   :  { %v260_v22 = vmax.f32 %v220_v16, %v244_v20 }
 0x100   :  { %v279_v23 = vpack.c.bf16 %v262_v21, %v261_v17 }
 0x101   :  { %v278_v24 = vpack.c.bf16 %v260_v22, %v259_v19 }
 0x103   :  { %674 = vmatprep.mubr.msk.bf16.mxu1 %vm310_vm1, %v278_v24 }
 0x104   :  { %675 = vmatmul.mubr.msk.bf16.gmra.mrb[28].mxu1 %vm310_vm1, %v279_v23 }
 0x1bf   :  { %v664_v28 = vpop.f32.mrb[16].mxu1 }
 0x1c0   :  { %v378_v29 = vadd.f32 %v664_v28, %v876_v27  ;;  %v369_v30 = vpop.f32.mrb[17].mxu1 }
 0x1c1   :  { %v370_v31 = vadd.f32 %v876_v27, %v369_v30  ;;  %v665_v32 = vpop.f32.mrb[18].mxu1 }
 0x1c2   :  { %v434_v33 = vmul.f32 0.01, %v378_v29  ;;  %v381_v34 = vadd.f32 %v665_v32, %v876_v27  ;;  %v372_v35 = vpop.f32.mrb[19].mxu1 }
 0x1c3   :  { %v432_v36 = vmul.f32 0.01, %v370_v31  ;;  %v373_v37 = vadd.f32 %v876_v27, %v372_v35 }
 0x1c4   :  { %v435_v38 = vmul.f32 0.01, %v381_v34  ;;  %v450_v40 = vmax.f32 %v378_v29, %v434_v33 }
 0x1c5   :  { %v433_v39 = vmul.f32 0.01, %v373_v37  ;;  %v448_v42 = vmax.f32 %v370_v31, %v432_v36 }
 0x1c6   :  { %v451_v41 = vmax.f32 %v381_v34, %v435_v38 }
 0x1c7   :  { %v449_v43 = vmax.f32 %v373_v37, %v433_v39  ;;  %v668_v44 = vpop.f32.mrb[20].mxu1 }
 0x1c8   :  { %v394_v45 = vadd.f32 %v668_v44, %v876_v27  ;;  %v385_v46 = vpop.f32.mrb[21].mxu1  ;;  %v467_v47 = vpack.c.bf16 %v451_v41, %v450_v40 }
 0x1c9   :  { %v386_v48 = vadd.f32 %v876_v27, %v385_v46  ;;  %v669_v49 = vpop.f32.mrb[22].mxu1  ;;  %v466_v50 = vpack.c.bf16 %v449_v43, %v448_v42  ;;  %v479_v46 = vlaneseq }
 0x1ca   :  { %v438_v51 = vmul.f32 0.01, %v394_v45  ;;  %v397_v52 = vadd.f32 %v669_v49, %v876_v27  ;;  %v388_v53 = vpop.f32.mrb[23].mxu1  ;;  %v490_v9 = vsel %vm109_vm0, %v467_v47, 0  ;;  %v477_v49 = vpop.permute.xlu0 %476 }
 0x1cb   :  { %v436_v54 = vmul.f32 0.01, %v386_v48  ;;  %v389_v55 = vadd.f32 %v876_v27, %v388_v53  ;;  %v487_v56 = vsel %vm109_vm0, %v466_v50, 0  ;;  %v480_v47 = vshrl.u32 %v479_v46, 7 }
 0x1cc   :  { %v439_v57 = vmul.f32 0.01, %v397_v52  ;;  %679 = vmatpush3.bf16.xpose.msra.mxu0 %v487_v56  ;;  %v454_v59 = vmax.f32 %v394_v45, %v438_v51  ;;  %v464_v45 = vld [vmem:[%s930_s5] sm:$0x1]  ;;  %s562_s5 = sshll.u32 %s748_s8, 4  ;;  %s563_s5 = int_to_ptr.vmem [resolvable:$true] %s562_s5 }
 0x1cd   :  { %v437_v58 = vmul.f32 0.01, %v389_v55  ;;  %680 = vmatprep.subr.bf16.mxu0 %v745_v25  ;;  %v452_v61 = vmax.f32 %v386_v48, %v436_v54  ;;  %v481_v48 = vsub.s32 0, %v480_v47  ;;  %s721_s6 = scalar_lea.vmem %s563_s5, 16  ;;  %s725_s9 = scalar_lea.vmem %s563_s5, 32 }
 0x1ce   :  { %v455_v60 = vmax.f32 %v397_v52, %v439_v57  ;;  %p722_p0 = scmp.ne.s32.totalorder %s563_s5, %s721_s6  ;;  %p726_p1 = scmp.lt.s32.totalorder %s563_s5, %s563_s5 }
 0x1cf   :  { %v453_v62 = vmax.f32 %v389_v55, %v437_v58  ;;  %v672_v63 = vpop.f32.mrb[24].mxu1  ;;  %v482_v50 = vrot.slane %v477_v49, %v481_v48  ;;  %p727_p2 = scmp.lt.s32.totalorder %s725_s9, %s721_s6 }
 0x1d0   :  { %v410_v0 = vadd.f32 %v672_v63, %v876_v27  ;;  %v401_v1 = vpop.f32.mrb[25].mxu1  ;;  %v469_v2 = vpack.c.bf16 %v455_v60, %v454_v59 }
 0x1d1   :  { %v402_v3 = vadd.f32 %v876_v27, %v401_v1  ;;  %v673_v4 = vpop.f32.mrb[26].mxu1  ;;  %v468_v5 = vpack.c.bf16 %v453_v62, %v452_v61  ;;  %p728_p3 = por %p727_p2, %p726_p1 }
 0x1d2   :  { %v442_v6 = vmul.f32 0.01, %v410_v0  ;;  %v413_v7 = vadd.f32 %v673_v4, %v876_v27  ;;  %v404_v8 = vpop.f32.mrb[27].mxu1  ;;  %v496_v41 = vsel %vm109_vm0, %v469_v2, 0 }
 0x1d3   :  { %v440_v10 = vmul.f32 0.01, %v402_v3  ;;  %v405_v11 = vadd.f32 %v876_v27, %v404_v8  ;;  %v493_v30 = vsel %vm109_vm0, %v468_v5, 0  ;;  %p729_p4 = pnand %p728_p3, %p722_p0 }
 0x1d4   :  { %v458_v12 = vmax.f32 %v410_v0, %v442_v6  ;;  %681 = vmatpush3.bf16.xpose.msra.mxu0 %v490_v9  ;;  %v443_v13 = vmul.f32 0.01, %v413_v7 }
 0x1d5   :  { %v456_v14 = vmax.f32 %v402_v3, %v440_v10  ;;  %v441_v16 = vmul.f32 0.01, %v405_v11  ;;  %682 = vmatprep.subr.bf16.mxu0 %v745_v25 }
 0x1d6   :  { %v459_v17 = vmax.f32 %v413_v7, %v443_v13 }
 0x1d7   :  { %v457_v18 = vmax.f32 %v405_v11, %v441_v16  ;;  %v676_v19 = vpop.f32.mrb[28].mxu1 }
 0x1d8   :  { %v426_v20 = vadd.f32 %v676_v19, %v876_v27  ;;  %v417_v21 = vpop.f32.mrb[29].mxu1  ;;  %v471_v22 = vpack.c.bf16 %v459_v17, %v458_v12 }
 0x1d9   :  { %v418_v23 = vadd.f32 %v876_v27, %v417_v21  ;;  %v677_v24 = vpop.f32.mrb[30].mxu1  ;;  %v470_v15 = vpack.c.bf16 %v457_v18, %v456_v14 }
 0x1da   :  { %v446_v26 = vmul.f32 0.01, %v426_v20  ;;  %v429_v28 = vadd.f32 %v677_v24, %v876_v27  ;;  %v420_v29 = vpop.f32.mrb[31].mxu1 }
 0x1db   :  { %v444_v31 = vmul.f32 0.01, %v418_v23  ;;  %v421_v32 = vadd.f32 %v876_v27, %v420_v29  ;;  %v499_v42 = vsel %vm109_vm0, %v470_v15, 0  ;;  %v502_v27 = vsel %vm109_vm0, %v471_v22, 0 }
 0x1dc   :  { %683 = vmatpush3.bf16.xpose.msra.mxu0 %v493_v30  ;;  %v462_v33 = vmax.f32 %v426_v20, %v446_v26  ;;  %v447_v34 = vmul.f32 0.01, %v429_v28 }
 0x1dd   :  { %684 = vmatprep.subr.bf16.mxu0 %v745_v25  ;;  %v460_v35 = vmax.f32 %v418_v23, %v444_v31  ;;  %v445_v36 = vmul.f32 0.01, %v421_v32 }
 0x1de   :  { %v463_v37 = vmax.f32 %v429_v28, %v447_v34 }
 0x1df   :  { %v461_v38 = vmax.f32 %v421_v32, %v445_v36 }
 0x1e0   :  { %v473_v39 = vpack.c.bf16 %v463_v37, %v462_v33 }
 0x1e1   :  { %v472_v40 = vpack.c.bf16 %v461_v38, %v460_v35 }
 0x1e2   :  { %v508_v44 = vsel %vm109_vm0, %v473_v39, 0 }
 0x1e3   :  { %v505_v43 = vsel %vm109_vm0, %v472_v40, 0 }
 0x1e4   :  { %685 = vmatpush3.bf16.xpose.msra.mxu0 %v496_v41 }
 0x1e5   :  { %686 = vmatprep.subr.bf16.mxu0 %v745_v25 }
 0x1ec   :  { %687 = vmatpush3.bf16.xpose.msra.mxu0 %v499_v42 }
 0x1ed   :  { %688 = vmatprep.subr.bf16.mxu0 %v745_v25 }
 0x1f4   :  { %689 = vmatpush3.bf16.xpose.msra.mxu0 %v502_v27 }
 0x1f5   :  { %690 = vmatprep.subr.bf16.mxu0 %v745_v25 }
 0x1fc   :  { %691 = vmatpush3.bf16.xpose.msra.mxu0 %v505_v43 }
 0x1fd   :  { %692 = vmatprep.subr.bf16.mxu0 %v745_v25 }
 0x204   :  { %693 = vmatpush3.bf16.xpose.msra.mxu0 %v508_v44 }
 0x20b   :  { %695 = vmatmul.mubr.msk.bf16.vlgmr.msra.gmra.mrb[0].mxu0 %vm109_vm0, %v464_v45 }
 0x2de   :  { %v544_v51 = vpop.f32.mrb[0].mxu0 }
 0x2df   :  { %v545_v52 = vadd.f32 %v544_v51, %v482_v50  ;;  %v696_v53 = vpop.f32.mrb[1].mxu0 }
 0x2e0   :  { %v547_v54 = vpop.f32.mrb[2].mxu0 }
 0x2e1   :  { %v550_v55 = vsub.f32 0.0, %v545_v52  ;;  %v697_v25 = vpop.f32.mrb[3].mxu0 }
 0x2e3   :  { %v551_v56 = vmul.f32 1.442695, %v550_v55 }
 0x2e5   :  { %717 = vpow2.f32 %v551_v56 }
 0x2ef   :  { %v718_v57 = vpop.eup %717 }
 0x2f0   :  { %v553_v58 = vadd.f32 1.0, %v718_v57 }
 0x2f2   :  { %719 = vrcp.f32 %v553_v58 }
 0x2fc   :  { %v720_v59 = vpop.eup %719 }
 0x2fd   :  { %555 = vst [vmem:[#allocation3] sm:$0x1] %v720_v59 }
 0x2fe   :  { %732 = shalt.err (!%p729_p4)
}
 0x2ff   :  { %s733_s1 = scalar_lea.hbm %s932_s7, 16 }
 0x300   :  { %p734_p5 = scmp.ne.s32.totalorder %s932_s7, %s733_s1  ;;  %p737_p6 = scmp.lt.u32.totalorder %s733_s1, %s932_s7 }
 0x302   :  { %p739_p7 = pnand %p737_p6, %p734_p5 }
 0x304   :  { %742 = shalt.err (!%p739_p7)
}
 0x305   :  { %565 = dma.vmem_to_hbm [thread:$0]  %s563_s5, 16, %s932_s7, [#allocation4]  }
 0x306   :  { %743 = dma.done.wait [#allocation4], 16  }
 0x307   :  { %744 = vsyncadd [#allocation4], 4294967280 }
 0x308   :  { %569 = vsyncpa [#allocation4], 1 }

</bundles_post_ra>
